<compile_context>
chip_gen: v7x
topology: tpu7x:2x2x1
jax: 0.10.0
libtpu: 0.0.40
codegen_flags: <defaults>
</compile_context>

<pallas_src>
import functools

import jax
import jax.numpy as jnp
from jax.experimental import pallas as pl
from jax.experimental.pallas import tpu as pltpu


# ----------------------------- Pallas kernels ------------------------------

def _fused_conv_bn_leaky_kernel(a_ref, w_ref, gamma_ref, beta_ref, o_ref,
                                sum_ref, sumsq_ref, scale_ref, shift_ref, *,
                                m_valid, tile_m, needs_mask, eps, neg_slope):
    """Two-phase fused conv(matmul) + BatchNorm(batch stats) + LeakyReLU.

    grid = (2, n_m_tiles):
      p == 0 : conv per M-tile, accumulate per-channel sum / sum-of-squares.
      p == 1 : recompute conv per M-tile, apply y*scale + shift, LeakyReLU, store.

    a_ref:     (tile_m, Kp) bf16/f32 im2col patch tile
    w_ref:     (Kp, Cp)     bf16/f32 reshaped conv weight (resident)
    gamma_ref: (1, Cp) f32, beta_ref: (1, Cp) f32
    o_ref:     (tile_m, Cp) f32 (lane-dense, Cp multiple of 128)
    scratch:   sum/sumsq/scale/shift each (1, Cp) f32, persist across the grid.
    """
    p = pl.program_id(0)
    m = pl.program_id(1)

    @pl.when(jnp.logical_and(p == 0, m == 0))
    def _():
        sum_ref[...] = jnp.zeros_like(sum_ref)
        sumsq_ref[...] = jnp.zeros_like(sumsq_ref)

    # conv-as-matmul for this M tile (bf16 inputs, f32 accumulate on the MXU).
    y = jnp.dot(a_ref[...], w_ref[...], preferred_element_type=jnp.float32)

    @pl.when(p == 0)
    def _():
        if needs_mask:   # mask padded rows out of the batch statistics
            rows = jax.lax.broadcasted_iota(jnp.int32, y.shape, 0) + m * tile_m
            y_stat = jnp.where(rows < m_valid, y, 0.0)
        else:
            y_stat = y
        sum_ref[...] += jnp.sum(y_stat, axis=0, keepdims=True)
        sumsq_ref[...] += jnp.sum(y_stat * y_stat, axis=0, keepdims=True)

    @pl.when(jnp.logical_and(p == 1, m == 0))
    def _():
        # Finalize per-channel BN coefficients exactly once.
        inv_m = jnp.float32(1.0 / m_valid)
        mean = sum_ref[...] * inv_m
        var = jnp.maximum(sumsq_ref[...] * inv_m - mean * mean, 0.0)  # biased
        inv_std = jax.lax.rsqrt(var + eps)
        s = gamma_ref[...] * inv_std
        scale_ref[...] = s
        shift_ref[...] = beta_ref[...] - mean * s

    @pl.when(p == 1)
    def _():
        z = y * scale_ref[...] + shift_ref[...]
        o_ref[...] = jnp.where(z >= 0.0, z, neg_slope * z).astype(o_ref.dtype)


def _conv_bias_kernel(a_ref, w_ref, bias_ref, o_ref):
    """Plain M-tiled conv-as-matmul + bias (bn_act=False path)."""
    y = jnp.dot(a_ref[...], w_ref[...], preferred_element_type=jnp.float32)
    o_ref[...] = (y + bias_ref[...]).astype(o_ref.dtype)


# ------------------------------- wrappers ----------------------------------

def _round_up(x, m):
    return (x + m - 1) // m * m


def _pad_cols(v, cp):
    """(C,) vector -> (1, Cp) f32 row, zero padded to lane-dense width."""
    c = v.shape[0]
    return jnp.pad(v.reshape(1, c).astype(jnp.float32), ((0, 0), (0, cp - c)))


@functools.partial(jax.jit,
                   static_argnames=("stride", "padding", "bn_act", "mxu_dtype"))
def cnn_block_forward(x, weight, bias, gamma, beta, *,
                      stride=1, padding=1, bn_act=True,
                      mxu_dtype=jnp.bfloat16):
    """Forward of CNNBlock.

    x:      (N, C_in, H, W)   NCHW (PyTorch convention)
    weight: (C_out, C_in, kh, kw)
    bias:   (C_out,)          only used when bn_act=False (Conv2d(bias=not bn_act))
    gamma, beta: (C_out,)     BatchNorm affine params
    returns (N, C_out, OH, OW)
    """
    N, C_in, H, W = x.shape
    C_out, _, kh, kw = weight.shape
    OH = (H + 2 * padding - kh) // stride + 1
    OW = (W + 2 * padding - kw) // stride + 1
    M = N * OH * OW
    K = kh * kw * C_in

    # --- im2col (XLA glue), NHWC so the patch axis is the lane/contraction axis.
    # TODO(synk): for realistic conv sizes, do im2col inside the kernel
    # (kh*kw shifted-slice dots on a VMEM-resident NHWC tile) to avoid the
    # kh*kw-fold HBM blow-up of the A operand.
    x_nhwc = jnp.transpose(x, (0, 2, 3, 1))
    x_pad = jnp.pad(x_nhwc, ((0, 0), (padding, padding),
                             (padding, padding), (0, 0)))
    patches = [
        x_pad[:, i:i + stride * OH:stride, j:j + stride * OW:stride, :]
        for i in range(kh) for j in range(kw)
    ]
    a = jnp.concatenate(patches, axis=-1).reshape(M, K)

    # weight (C_out, C_in, kh, kw) -> (kh, kw, C_in, C_out) -> (K, C_out)
    w_mat = jnp.transpose(weight, (2, 3, 1, 0)).reshape(K, C_out)

    # --- tiling / padding: K only to a sublane multiple, channels lane-dense.
    tile_m = 256 if M >= 256 else _round_up(M, 8)
    Mp = _round_up(M, tile_m)
    n_tiles = Mp // tile_m
    Kp = _round_up(K, 8)
    Cp = _round_up(C_out, 128)

    a_p = jnp.pad(a.astype(mxu_dtype), ((0, Mp - M), (0, Kp - K)))
    w_p = jnp.pad(w_mat.astype(mxu_dtype), ((0, Kp - K), (0, Cp - C_out)))

    if bn_act:
        g_p = _pad_cols(gamma, Cp)
        b_p = _pad_cols(beta, Cp)
        kernel = functools.partial(
            _fused_conv_bn_leaky_kernel,
            m_valid=M, tile_m=tile_m, needs_mask=(Mp != M),
            eps=1e-5, neg_slope=0.2)
        y_p = pl.pallas_call(
            kernel,
            out_shape=jax.ShapeDtypeStruct((Mp, Cp), jnp.float32),
            grid_spec=pltpu.PrefetchScalarGridSpec(
                num_scalar_prefetch=0,
                grid=(2, n_tiles),                       # (phase, m-tile)
                in_specs=[
                    pl.BlockSpec((tile_m, Kp), lambda p, m: (m, 0)),
                    pl.BlockSpec((Kp, Cp), lambda p, m: (0, 0)),
                    pl.BlockSpec((1, Cp), lambda p, m: (0, 0)),
                    pl.BlockSpec((1, Cp), lambda p, m: (0, 0)),
                ],
                # During phase 0 the output block index stays at 0 and is never
                # written, so no garbage writebacks happen; phase 1 writes each
                # block exactly once.
                out_specs=pl.BlockSpec((tile_m, Cp), lambda p, m: (m * p, 0)),
                scratch_shapes=[pltpu.VMEM((1, Cp), jnp.float32)] * 4,
            ),
            compiler_params=pltpu.CompilerParams(
                dimension_semantics=("arbitrary", "arbitrary")),
        )(a_p, w_p, g_p, b_p)
    else:
        bias_p = _pad_cols(bias, Cp)
        y_p = pl.pallas_call(
            _conv_bias_kernel,
            out_shape=jax.ShapeDtypeStruct((Mp, Cp), jnp.float32),
            grid_spec=pltpu.PrefetchScalarGridSpec(
                num_scalar_prefetch=0,
                grid=(n_tiles,),
                in_specs=[
                    pl.BlockSpec((tile_m, Kp), lambda m: (m, 0)),
                    pl.BlockSpec((Kp, Cp), lambda m: (0, 0)),
                    pl.BlockSpec((1, Cp), lambda m: (0, 0)),
                ],
                out_specs=pl.BlockSpec((tile_m, Cp), lambda m: (m, 0)),
            ),
            compiler_params=pltpu.CompilerParams(
                dimension_semantics=("parallel",)),
        )(a_p, w_p, bias_p)

    y = y_p[:M, :C_out].reshape(N, OH, OW, C_out)
    return jnp.transpose(y, (0, 3, 1, 2))            # back to NCHW
    # TODO(synk): PyTorch BN running_mean/var buffer updates are not emitted
    # (forward-output parity only).


# Pure-JAX reference for sanity checking the fused kernel.
def _reference_forward(x, weight, bias, gamma, beta, *, stride, padding, bn_act):
    y = jax.lax.conv_general_dilated(
        x, weight, window_strides=(stride, stride),
        padding=[(padding, padding), (padding, padding)],
        dimension_numbers=("NCHW", "OIHW", "NCHW"))
    if not bn_act:
        return y + bias.reshape(1, -1, 1, 1)
    mean = jnp.mean(y, axis=(0, 2, 3), keepdims=True)
    var = jnp.mean((y - mean) ** 2, axis=(0, 2, 3), keepdims=True)
    z = (y - mean) * jax.lax.rsqrt(var + 1e-5)
    z = z * gamma.reshape(1, -1, 1, 1) + beta.reshape(1, -1, 1, 1)
    return jnp.where(z >= 0.0, z, 0.2 * z)


# --------------------------------- main -------------------------------------

if __name__ == "__main__":
    key = jax.random.PRNGKey(0)
    k_x, k_w, k_b, k_g, k_be, k_x2 = jax.random.split(key, 6)

    # CNNBlock(in_channels=4, out_channels=8, bn_act=True,
    #          kernel_size=3, stride=1, padding=1)
    N, C_in, H, W = 2, 4, 16, 16
    C_out, kh, kw = 8, 3, 3

    x = jax.random.normal(k_x, (N, C_in, H, W), jnp.float32)
    weight = 0.1 * jax.random.normal(k_w, (C_out, C_in, kh, kw), jnp.float32)
    bias = 0.1 * jax.random.normal(k_b, (C_out,), jnp.float32)
    gamma = 1.0 + 0.1 * jax.random.normal(k_g, (C_out,), jnp.float32)
    beta = 0.1 * jax.random.normal(k_be, (C_out,), jnp.float32)

    # 1) bn_act=True path (conv -> BN -> LeakyReLU), fully fused, 2 M-tiles.
    out = cnn_block_forward(x, weight, bias, gamma, beta,
                            stride=1, padding=1, bn_act=True)
    jax.block_until_ready(out)
    assert out.shape == (N, C_out, H, W)
    ref = _reference_forward(x, weight, bias, gamma, beta,
                             stride=1, padding=1, bn_act=True)
    assert float(jnp.max(jnp.abs(out - ref))) < 5e-2   # bf16-MXU tolerance

    # 2) bn_act=False path (conv + bias only).
    out_nb = cnn_block_forward(x, weight, bias, gamma, beta,
                               stride=1, padding=1, bn_act=False)
    jax.block_until_ready(out_nb)
    ref_nb = _reference_forward(x, weight, bias, gamma, beta,
                                stride=1, padding=1, bn_act=False)
    assert float(jnp.max(jnp.abs(out_nb - ref_nb))) < 5e-2

    # 3) bn_act=True with M not a multiple of the tile (exercises the
    #    padded-row statistics mask and multi-tile accumulation).
    H2 = W2 = 13
    x2 = jax.random.normal(k_x2, (N, C_in, H2, W2), jnp.float32)
    out2 = cnn_block_forward(x2, weight, bias, gamma, beta,
                             stride=1, padding=1, bn_act=True)
    jax.block_until_ready(out2)
    assert out2.shape == (N, C_out, H2, W2)
    ref2 = _reference_forward(x2, weight, bias, gamma, beta,
                              stride=1, padding=1, bn_act=True)
    assert float(jnp.max(jnp.abs(out2 - ref2))) < 5e-2

    print("KERNEL_OK")
</pallas_src>

<mosaic_0001>
module attributes {stable_mosaic.version = 11 : i64} {
  func.func @_fused_conv_bn_leaky_kernel(%arg0: i32, %arg1: i32, %arg2: memref<256x40xbf16, #tpu.memory_space<vmem>>, %arg3: memref<40x128xbf16, #tpu.memory_space<vmem>>, %arg4: memref<1x128xf32, #tpu.memory_space<vmem>>, %arg5: memref<1x128xf32, #tpu.memory_space<vmem>>, %arg6: memref<256x128xf32, #tpu.memory_space<vmem>>, %arg7: memref<1x128xf32, #tpu.memory_space<vmem>>, %arg8: memref<1x128xf32, #tpu.memory_space<vmem>>, %arg9: memref<1x128xf32, #tpu.memory_space<vmem>>, %arg10: memref<1x128xf32, #tpu.memory_space<vmem>>) attributes {dimension_semantics = [#tpu.dimension_semantics<arbitrary>, #tpu.dimension_semantics<arbitrary>], iteration_bounds = array<i64: 2, 2>, scalar_prefetch = 0 : i64, scratch_operands = 4 : i64, tpu.core_type = #tpu.core_type<tc>, window_params = [{transform_indices = @transform_0, window_bounds = array<i64: 256, 40>}, {pipeline_mode = #tpu.pipeline_mode<synchronous>, transform_indices = @transform_1, window_bounds = array<i64: 40, 128>}, {pipeline_mode = #tpu.pipeline_mode<synchronous>, transform_indices = @transform_2, window_bounds = array<i64: 1, 128>}, {pipeline_mode = #tpu.pipeline_mode<synchronous>, transform_indices = @transform_3, window_bounds = array<i64: 1, 128>}, {transform_indices = @transform_4, window_bounds = array<i64: 256, 128>}]} {
    %c0_i32 = arith.constant 0 : i32
    %0 = arith.cmpi eq, %arg0, %c0_i32 : i32
    %c0_i32_0 = arith.constant 0 : i32
    %1 = arith.cmpi eq, %arg1, %c0_i32_0 : i32
    %2 = arith.andi %0, %1 : i1
    %3 = arith.extui %2 : i1 to i32
    %c0_i32_1 = arith.constant 0 : i32
    %4 = arith.cmpi ne, %3, %c0_i32_1 : i32
    scf.if %4 {
      %cst_11 = arith.constant 0.000000e+00 : f32
      %19 = vector.broadcast %cst_11 : f32 to vector<1x128xf32>
      %c0_12 = arith.constant 0 : index
      %c0_13 = arith.constant 0 : index
      %20 = vector.load %arg7[%c0_12, %c0_13] : memref<1x128xf32, #tpu.memory_space<vmem>>, vector<1x128xf32>
      tpu.vector_store %arg7[%c0_12, %c0_13], %19 {strides = array<i32>} : memref<1x128xf32, #tpu.memory_space<vmem>>, vector<1x128xf32>,
      %cst_14 = arith.constant 0.000000e+00 : f32
      %21 = vector.broadcast %cst_14 : f32 to vector<1x128xf32>
      %c0_15 = arith.constant 0 : index
      %c0_16 = arith.constant 0 : index
      %22 = vector.load %arg8[%c0_15, %c0_16] : memref<1x128xf32, #tpu.memory_space<vmem>>, vector<1x128xf32>
      tpu.vector_store %arg8[%c0_15, %c0_16], %21 {strides = array<i32>} : memref<1x128xf32, #tpu.memory_space<vmem>>, vector<1x128xf32>,
    } else {
    }
    %c0 = arith.constant 0 : index
    %c0_2 = arith.constant 0 : index
    %5 = vector.load %arg2[%c0, %c0_2] : memref<256x40xbf16, #tpu.memory_space<vmem>>, vector<256x40xbf16>
    %c0_3 = arith.constant 0 : index
    %c0_4 = arith.constant 0 : index
    %6 = vector.load %arg3[%c0_3, %c0_4] : memref<40x128xbf16, #tpu.memory_space<vmem>>, vector<40x128xbf16>
    %cst = arith.constant dense<0.000000e+00> : vector<256x128xf32>
    %7 = tpu.matmul %5, %6, %cst {dimension_numbers = #tpu.dot_dimension_numbers<[1], [0], [0], [1], [0, 0, 1, 1], [], []>} : vector<256x40xbf16>, vector<40x128xbf16>, vector<256x128xf32> -> vector<256x128xf32>
    %c0_i32_5 = arith.constant 0 : i32
    %8 = arith.cmpi eq, %arg0, %c0_i32_5 : i32
    %9 = arith.extui %8 : i1 to i32
    %c0_i32_6 = arith.constant 0 : i32
    %10 = arith.cmpi ne, %9, %c0_i32_6 : i32
    scf.if %10 {
      %c0_11 = arith.constant 0 : index
      %c0_12 = arith.constant 0 : index
      %19 = vector.load %arg7[%c0_11, %c0_12] : memref<1x128xf32, #tpu.memory_space<vmem>>, vector<1x128xf32>
      %cst_13 = arith.constant dense<0.000000e+00> : vector<128xf32>
      %20 = vector.multi_reduction <add>, %7, %cst_13 [0] : vector<256x128xf32> to vector<128xf32>
      %21 = vector.shape_cast %20 : vector<128xf32> to vector<1x128xf32>
      %22 = arith.addf %19, %21 : vector<1x128xf32>
      %c0_14 = arith.constant 0 : index
      %c0_15 = arith.constant 0 : index
      %23 = vector.load %arg7[%c0_14, %c0_15] : memref<1x128xf32, #tpu.memory_space<vmem>>, vector<1x128xf32>
      tpu.vector_store %arg7[%c0_14, %c0_15], %22 {strides = array<i32>} : memref<1x128xf32, #tpu.memory_space<vmem>>, vector<1x128xf32>,
      %c0_16 = arith.constant 0 : index
      %c0_17 = arith.constant 0 : index
      %24 = vector.load %arg8[%c0_16, %c0_17] : memref<1x128xf32, #tpu.memory_space<vmem>>, vector<1x128xf32>
      %25 = arith.mulf %7, %7 : vector<256x128xf32>
      %cst_18 = arith.constant dense<0.000000e+00> : vector<128xf32>
      %26 = vector.multi_reduction <add>, %25, %cst_18 [0] : vector<256x128xf32> to vector<128xf32>
      %27 = vector.shape_cast %26 : vector<128xf32> to vector<1x128xf32>
      %28 = arith.addf %24, %27 : vector<1x128xf32>
      %c0_19 = arith.constant 0 : index
      %c0_20 = arith.constant 0 : index
      %29 = vector.load %arg8[%c0_19, %c0_20] : memref<1x128xf32, #tpu.memory_space<vmem>>, vector<1x128xf32>
      tpu.vector_store %arg8[%c0_19, %c0_20], %28 {strides = array<i32>} : memref<1x128xf32, #tpu.memory_space<vmem>>, vector<1x128xf32>,
    } else {
    }
    %c1_i32 = arith.constant 1 : i32
    %11 = arith.cmpi eq, %arg0, %c1_i32 : i32
    %c0_i32_7 = arith.constant 0 : i32
    %12 = arith.cmpi eq, %arg1, %c0_i32_7 : i32
    %13 = arith.andi %11, %12 : i1
    %14 = arith.extui %13 : i1 to i32
    %c0_i32_8 = arith.constant 0 : i32
    %15 = arith.cmpi ne, %14, %c0_i32_8 : i32
    scf.if %15 {
      %c0_11 = arith.constant 0 : index
      %c0_12 = arith.constant 0 : index
      %19 = vector.load %arg7[%c0_11, %c0_12] : memref<1x128xf32, #tpu.memory_space<vmem>>, vector<1x128xf32>
      %cst_13 = arith.constant 0.001953125 : f32
      %20 = vector.broadcast %cst_13 : f32 to vector<1x128xf32>
      %21 = arith.mulf %19, %20 : vector<1x128xf32>
      %c0_14 = arith.constant 0 : index
      %c0_15 = arith.constant 0 : index
      %22 = vector.load %arg8[%c0_14, %c0_15] : memref<1x128xf32, #tpu.memory_space<vmem>>, vector<1x128xf32>
      %cst_16 = arith.constant 0.001953125 : f32
      %23 = vector.broadcast %cst_16 : f32 to vector<1x128xf32>
      %24 = arith.mulf %22, %23 : vector<1x128xf32>
      %25 = arith.mulf %21, %21 : vector<1x128xf32>
      %26 = arith.subf %24, %25 : vector<1x128xf32>
      %cst_17 = arith.constant 0.000000e+00 : f32
      %27 = vector.broadcast %cst_17 : f32 to vector<1x128xf32>
      %28 = arith.maximumf %26, %27 : vector<1x128xf32>
      %cst_18 = arith.constant 9.99999974E-6 : f32
      %29 = vector.broadcast %cst_18 : f32 to vector<1x128xf32>
      %30 = arith.addf %28, %29 : vector<1x128xf32>
      %31 = math.rsqrt %30 : vector<1x128xf32>
      %c0_19 = arith.constant 0 : index
      %c0_20 = arith.constant 0 : index
      %32 = vector.load %arg4[%c0_19, %c0_20] : memref<1x128xf32, #tpu.memory_space<vmem>>, vector<1x128xf32>
      %33 = arith.mulf %32, %31 : vector<1x128xf32>
      %c0_21 = arith.constant 0 : index
      %c0_22 = arith.constant 0 : index
      %34 = vector.load %arg9[%c0_21, %c0_22] : memref<1x128xf32, #tpu.memory_space<vmem>>, vector<1x128xf32>
      tpu.vector_store %arg9[%c0_21, %c0_22], %33 {strides = array<i32>} : memref<1x128xf32, #tpu.memory_space<vmem>>, vector<1x128xf32>,
      %c0_23 = arith.constant 0 : index
      %c0_24 = arith.constant 0 : index
      %35 = vector.load %arg5[%c0_23, %c0_24] : memref<1x128xf32, #tpu.memory_space<vmem>>, vector<1x128xf32>
      %36 = arith.mulf %21, %33 : vector<1x128xf32>
      %37 = arith.subf %35, %36 : vector<1x128xf32>
      %c0_25 = arith.constant 0 : index
      %c0_26 = arith.constant 0 : index
      %38 = vector.load %arg10[%c0_25, %c0_26] : memref<1x128xf32, #tpu.memory_space<vmem>>, vector<1x128xf32>
      tpu.vector_store %arg10[%c0_25, %c0_26], %37 {strides = array<i32>} : memref<1x128xf32, #tpu.memory_space<vmem>>, vector<1x128xf32>,
    } else {
    }
    %c1_i32_9 = arith.constant 1 : i32
    %16 = arith.cmpi eq, %arg0, %c1_i32_9 : i32
    %17 = arith.extui %16 : i1 to i32
    %c0_i32_10 = arith.constant 0 : i32
    %18 = arith.cmpi ne, %17, %c0_i32_10 : i32
    scf.if %18 {
      %c0_11 = arith.constant 0 : index
      %c0_12 = arith.constant 0 : index
      %19 = vector.load %arg9[%c0_11, %c0_12] : memref<1x128xf32, #tpu.memory_space<vmem>>, vector<1x128xf32>
      %20 = vector.broadcast %19 : vector<1x128xf32> to vector<256x128xf32>
      %21 = arith.mulf %7, %20 : vector<256x128xf32>
      %c0_13 = arith.constant 0 : index
      %c0_14 = arith.constant 0 : index
      %22 = vector.load %arg10[%c0_13, %c0_14] : memref<1x128xf32, #tpu.memory_space<vmem>>, vector<1x128xf32>
      %23 = vector.broadcast %22 : vector<1x128xf32> to vector<256x128xf32>
      %24 = arith.addf %21, %23 : vector<256x128xf32>
      %cst_15 = arith.constant 0.000000e+00 : f32
      %25 = vector.broadcast %cst_15 : f32 to vector<256x128xf32>
      %26 = arith.cmpf oge, %24, %25 : vector<256x128xf32>
      %cst_16 = arith.constant 2.000000e-01 : f32
      %27 = vector.broadcast %cst_16 : f32 to vector<256x128xf32>
      %28 = arith.mulf %27, %24 : vector<256x128xf32>
      %29 = arith.select %26, %24, %28 : vector<256x128xi1>, vector<256x128xf32>
      %c0_17 = arith.constant 0 : index
      %c0_18 = arith.constant 0 : index
      %30 = vector.load %arg6[%c0_17, %c0_18] : memref<256x128xf32, #tpu.memory_space<vmem>>, vector<256x128xf32>
      tpu.vector_store %arg6[%c0_17, %c0_18], %29 {strides = array<i32>} : memref<256x128xf32, #tpu.memory_space<vmem>>, vector<256x128xf32>,
    } else {
    }
    return
  }
  func.func @transform_0(%arg0: i32, %arg1: i32) -> (i32, i32) {
    %c0_i32 = arith.constant 0 : i32
    %c0_i32_0 = arith.constant 0 : i32
    return %arg1, %c0_i32 : i32, i32
  }
  func.func @transform_1(%arg0: i32, %arg1: i32) -> (i32, i32) {
    %c0_i32 = arith.constant 0 : i32
    %c0_i32_0 = arith.constant 0 : i32
    %c0_i32_1 = arith.constant 0 : i32
    return %c0_i32, %c0_i32_0 : i32, i32
  }
  func.func @transform_2(%arg0: i32, %arg1: i32) -> (i32, i32) {
    %c0_i32 = arith.constant 0 : i32
    %c0_i32_0 = arith.constant 0 : i32
    %c0_i32_1 = arith.constant 0 : i32
    return %c0_i32, %c0_i32_0 : i32, i32
  }
  func.func @transform_3(%arg0: i32, %arg1: i32) -> (i32, i32) {
    %c0_i32 = arith.constant 0 : i32
    %c0_i32_0 = arith.constant 0 : i32
    %c0_i32_1 = arith.constant 0 : i32
    return %c0_i32, %c0_i32_0 : i32, i32
  }
  func.func @transform_4(%arg0: i32, %arg1: i32) -> (i32, i32) {
    %0 = arith.muli %arg1, %arg0 : i32
    %c0_i32 = arith.constant 0 : i32
    %c0_i32_0 = arith.constant 0 : i32
    return %0, %c0_i32 : i32, i32
  }
}

</mosaic_0001>

<bundles_post_ra>
// kernel: cnn_block_forward.1
= control target key start
LH: loop header
LB: loop body
LE: loop exit
PB: predicated region body
PF: predicated region fallthrough
CT: control target
= control target key end

     0   :  { %s1232_s15 = smov 0   ;;  %s1234_s16 = smov 0   ;;  %s1642_s0 = inlined_call_operand.vmem [shape: bf16[512,40], index: 0, kind: input, shape index: {}]   ;;  %s1643_s1 = inlined_call_operand.vmem [shape: bf16[40,128], index: 1, kind: input, shape index: {}]   ;;  %s1644_s2 = inlined_call_operand.vmem [shape: f32[1,128], index: 2, kind: input, shape index: {}]   ;;  %s1645_s3 = inlined_call_operand.vmem [shape: f32[1,128], index: 3, kind: input, shape index: {}]   ;;  %s1646_s4 = inlined_call_operand.vmem [shape: f32[512,128], index: 4, kind: output, shape index: {}]  }
   0x1   :  { %s1236_s17 = smov 0   ;;  %s1238_s18 = smov 0  }
   0x2   :  { %s1240_s19 = smov 0  }
   0x3 LB: > { %s23_s20 = sadd.s32 1, %s1196_s17  ;;  %s26_s21 = sadd.s32 1, %s1200_s18  ;;  %s1204_s19 = sphi %s1240_s19, %s14_s19   ;;  %s1200_s18 = sphi %s1238_s18, %s1650_s18   ;;  %s1196_s17 = sphi %s1236_s17, %s1649_s17   ;;  %s1192_s16 = sphi %s1234_s16, %s1648_s16   ;;  %s1188_s15 = sphi %s1232_s15, %s1647_s15  }
   0x4   : > { %p24_p0 = scmp.ge.s32.totalorder %s23_s20, 2  ;;  %p993_p1 = scmp.ge.s32.totalorder %s1204_s19, 1 }
   0x5   : > { %p177_p2 = scmp.lt.s32.totalorder %s1204_s19, 5 }
   0x6   : > { %s1652_s20 = smov (%p24_p0, %s23_s20), 0  ;;  %s1654_s21 = smov (!%p24_p0, %s26_s21), %s1200_s18 }
   0x7   : > { %p178_p3 = pnand %p993_p1, %p177_p2  ;;  %p28_p4 = scmp.ge.s32.totalorder %s1654_s21, 2 }
   0x8   : > { %s994_s22 = sshll.u32 (!%p178_p3), %s1188_s15, 5  ;;  %s210_s23 = smul.u32 (!%p178_p3), %s1188_s15, %s1192_s16 }
   0x9   : > { %s1656_s21 = smov (%p28_p4, %s1654_s21), 0  ;;  %181 = sbr.rel (%p178_p3) target bundleno = 413 (0x19d), region = 36 }
   0xa   : > { %p205_p5 = scmp.lt.s32.totalorder (!%p178_p3), %s994_s22, 63  ;;  %p219_p6 = scmp.eq.s32.totalorder (!%p178_p3), %s1192_s16, 0 }
   0xb   : > { %s996_s24 = sshll.u32 (!%p178_p3), %s210_s23, 5  ;;  %p220_p7 = scmp.eq.s32.totalorder (!%p178_p3), %s1188_s15, 0 }
   0xc   : > { %p212_p8 = scmp.lt.s32.totalorder (!%p178_p3), %s996_s24, 63 }
   0xd   : > { %p221_p9 = pnand (!%p178_p3), %p220_p7, %p219_p6 }
  0x10   : > { %s1658_s22 = smov (!%p205_p5, %s994_s22), 63  ;;  %s1660_s24 = smov (!%p212_p8, %s996_s24), 63 }
  0x11   : > { %s995_s25 = sshll.u32 %s1658_s22, 2  ;;  %s997_s29 = sshll.u32 %s1660_s24, 3  ;;  %v1206_v0 = vmov (!%p221_p9), 0.0  }
  0x12   : > { %s1276_s28 = scalar_lea.vmem %s1642_s0, %s995_s25  ;;  %s1281_s6 = scalar_lea.vmem %s1646_s4, %s997_s29  ;;  %225 = vst [vmem:[#allocation2] sm:$0x1] (!%p221_p9), %v1206_v0  ;;  %226 = vst [vmem:[#allocation3] sm:$0x1] (!%p221_p9), %v1206_v0 }
  0x13   : > { %224 = sbr.rel (%p221_p9) target bundleno = 26 (0x1a), region = 40 }
  0x1a PF: > { %v1145_v1 = vld [vmem:[%s1643_s1] sm:$0xff]   ;;  %v1146_v2 = vld [vmem:[%s1643_s1 + $0x8] sm:$0xff]   ;;  %vm359_vm0 = vcmask 326656   ;;  %v1147_v3 = vld [vmem:[%s1643_s1 + $0x10] ss:$0 sps:$4 sm:$0xff]   ;;  %vm408_vm1 = vcmask 1043456  }
  0x1b   : > { %1058 = vmatprep.subr.bf16.mxu0 %v1145_v1  ;;  %1096 = vmatprep.subr.bf16.mxu1 %v1145_v1  ;;  %v1148_v4 = vld [vmem:[%s1276_s28] sm:$0xff]   ;;  %v410_v6 = vsel %vm408_vm1, %v1147_v3, 0  ;;  %v1150_v7 = vld [vmem:[%s1276_s28 + $0x8] sm:$0xff]   ;;  %v1152_v9 = vld [vmem:[%s1276_s28 + $0x10] sm:$0xff]   ;;  %p1033_p10 = scmp.ne.s32.totalorder %s1192_s16, 0 }
  0x1c   : > { %1059 = vmatpush3.bf16.msra.mxu0 %v1145_v1  ;;  %1099 = vmatpush3.bf16.msra.mxu1 %v1145_v1  ;;  %v1149_v5 = vld [vmem:[%s1276_s28 + $0x40] sm:$0xff]   ;;  %v1151_v8 = vld [vmem:[%s1276_s28 + $0x48] sm:$0xff]   ;;  %v1153_v10 = vld [vmem:[%s1276_s28 + $0x50] sm:$0xff]  }
  0x1d   : > { %1060 = vmatprep.subr.bf16.mxu0 %v1146_v2  ;;  %1097 = vmatprep.subr.bf16.mxu1 %v1146_v2  ;;  %v1154_v11 = vld [vmem:[%s1276_s28 + $0x18] sm:$0xff]   ;;  %v1156_v13 = vld [vmem:[%s1276_s28 + $0x20] sm:$0xff]   ;;  %v1158_v15 = vld [vmem:[%s1276_s28 + $0x28] sm:$0xff]  }
  0x1e   : > { %1064 = vmatprep.mubr.msk.bf16.mxu0 %vm359_vm0, %v1148_v4  ;;  %1080 = vmatprep.mubr.msk.bf16.mxu1 %vm359_vm0, %v1149_v5  ;;  %v1155_v12 = vld [vmem:[%s1276_s28 + $0x58] sm:$0xff]   ;;  %v1157_v14 = vld [vmem:[%s1276_s28 + $0x60] sm:$0xff]   ;;  %v1159_v16 = vld [vmem:[%s1276_s28 + $0x68] sm:$0xff]  }
  0x1f   : > { %v1160_v17 = vld [vmem:[%s1276_s28 + $0x30] sm:$0xff]   ;;  %v1162_v19 = vld [vmem:[%s1276_s28 + $0x38] sm:$0xff]  }
  0x20   : > { %1061 = vmatpush3.bf16.msra.mxu0 %v1146_v2  ;;  %1100 = vmatpush3.bf16.msra.mxu1 %v1146_v2  ;;  %v1161_v18 = vld [vmem:[%s1276_s28 + $0x70] sm:$0xff]   ;;  %v1163_v20 = vld [vmem:[%s1276_s28 + $0x78] sm:$0xff]  }
  0x21   : > { %1102 = vmatprep.subr.msk.bf16.mxu0 %vm408_vm1, %v1147_v3  ;;  %1103 = vmatprep.subr.msk.bf16.mxu1 %vm408_vm1, %v1147_v3 }
  0x24   : > { %1063 = vmatpush3.bf16.msra.mxu0 %v410_v6  ;;  %1101 = vmatpush3.bf16.msra.mxu1 %v410_v6 }
  0x27   : > { %1065 = vmatmul.mubr.msk.bf16.vlgmr.msra.gmra.mrb[0].mxu0 %vm359_vm0, %v1150_v7  ;;  %1081 = vmatmul.mubr.msk.bf16.vlgmr.msra.gmra.mrb[0].mxu1 %vm359_vm0, %v1151_v8 }
  0x28   : > { %1068 = vmatprep.mubr.msk.bf16.mxu0 %vm359_vm0, %v1152_v9  ;;  %1084 = vmatprep.mubr.msk.bf16.mxu1 %vm359_vm0, %v1153_v10 }
  0x2f   : > { %1069 = vmatmul.mubr.msk.bf16.gmra.mrb[4].mxu0 %vm359_vm0, %v1154_v11  ;;  %1085 = vmatmul.mubr.msk.bf16.gmra.mrb[4].mxu1 %vm359_vm0, %v1155_v12 }
  0x30   : > { %1072 = vmatprep.mubr.msk.bf16.mxu0 %vm359_vm0, %v1156_v13  ;;  %1088 = vmatprep.mubr.msk.bf16.mxu1 %vm359_vm0, %v1157_v14 }
  0x37   : > { %1073 = vmatmul.mubr.msk.bf16.gmra.mrb[8].mxu0 %vm359_vm0, %v1158_v15  ;;  %1089 = vmatmul.mubr.msk.bf16.gmra.mrb[8].mxu1 %vm359_vm0, %v1159_v16 }
  0x38   : > { %1076 = vmatprep.mubr.msk.bf16.mxu0 %vm359_vm0, %v1160_v17  ;;  %1092 = vmatprep.mubr.msk.bf16.mxu1 %vm359_vm0, %v1161_v18 }
  0x3f   : > { %1077 = vmatmul.mubr.msk.bf16.gmra.mrb[12].mxu0 %vm359_vm0, %v1162_v19  ;;  %1093 = vmatmul.mubr.msk.bf16.gmra.mrb[12].mxu1 %vm359_vm0, %v1163_v20 }
  0xfa   : > { %v1324_v21 = vpop.f32.mrb[0].mxu0  ;;  %v1326_v22 = vpop.f32.mrb[0].mxu1 }
  0xfb   : > { %v1328_v23 = vpop.f32.mrb[1].mxu0  ;;  %v1330_v24 = vpop.f32.mrb[1].mxu1  ;;  %v619_v59 = vmul.f32 (!%p1033_p10), %v1324_v21, %v1324_v21 }
  0xfc   : > { %v1332_v25 = vpop.f32.mrb[2].mxu0  ;;  %v1334_v26 = vpop.f32.mrb[2].mxu1  ;;  %v617_v56 = vmul.f32 (!%p1033_p10), %v1328_v23, %v1328_v23 }
  0xfd   : > { %v1336_v27 = vpop.f32.mrb[3].mxu0  ;;  %v1338_v28 = vpop.f32.mrb[3].mxu1  ;;  %v620_v61 = vmul.f32 (!%p1033_p10), %v1332_v25, %v1332_v25 }
  0xfe   : > { %v577_v53 = vadd.f32 (!%p1033_p10), %v1336_v27, %v1328_v23  ;;  %v618_v57 = vmul.f32 (!%p1033_p10), %v1336_v27, %v1336_v27 }
 0x100   : > { %v578_v54 = vadd.f32 (!%p1033_p10), %v1324_v21, %v577_v53  ;;  %v649_v62 = vadd.f32 (!%p1033_p10), %v618_v57, %v617_v56 }
 0x102   : > { %v1340_v29 = vpop.f32.mrb[4].mxu0  ;;  %v1342_v30 = vpop.f32.mrb[4].mxu1  ;;  %v579_v55 = vadd.f32 (!%p1033_p10), %v1332_v25, %v578_v54  ;;  %v650_v1 = vadd.f32 (!%p1033_p10), %v649_v62, %v619_v59 }
 0x103   : > { %v1344_v31 = vpop.f32.mrb[5].mxu0  ;;  %v1346_v32 = vpop.f32.mrb[5].mxu1  ;;  %v623_v6 = vmul.f32 (!%p1033_p10), %v1340_v29, %v1340_v29 }
 0x104   : > { %v1348_v33 = vpop.f32.mrb[6].mxu0  ;;  %v1350_v34 = vpop.f32.mrb[6].mxu1  ;;  %v580_v58 = vadd.f32 (!%p1033_p10), %v579_v55, %v1344_v31  ;;  %v621_v0 = vmul.f32 (!%p1033_p10), %v1344_v31, %v1344_v31  ;;  %v651_v4 = vadd.f32 (!%p1033_p10), %v650_v1, %v620_v61 }
 0x105   : > { %v1352_v35 = vpop.f32.mrb[7].mxu0  ;;  %v1354_v36 = vpop.f32.mrb[7].mxu1  ;;  %v624_v9 = vmul.f32 (!%p1033_p10), %v1348_v33, %v1348_v33 }
 0x106   : > { %v581_v60 = vadd.f32 (!%p1033_p10), %v580_v58, %v1352_v35  ;;  %v622_v3 = vmul.f32 (!%p1033_p10), %v1352_v35, %v1352_v35  ;;  %v652_v7 = vadd.f32 (!%p1033_p10), %v651_v4, %v621_v0  ;;  %v633_v4 = vmul.f32 (!%p1033_p10), %v1330_v24, %v1330_v24 }
 0x108   : > { %v582_v63 = vadd.f32 (!%p1033_p10), %v1340_v29, %v581_v60  ;;  %v653_v10 = vadd.f32 (!%p1033_p10), %v652_v7, %v622_v3  ;;  %v634_v7 = vmul.f32 (!%p1033_p10), %v1338_v28, %v1338_v28 }
 0x10a   : > { %v1356_v37 = vpop.f32.mrb[8].mxu0  ;;  %v1358_v38 = vpop.f32.mrb[8].mxu1  ;;  %v583_v2 = vadd.f32 (!%p1033_p10), %v1348_v33, %v582_v63  ;;  %v654_v13 = vadd.f32 (!%p1033_p10), %v653_v10, %v623_v6  ;;  %v635_v10 = vmul.f32 (!%p1033_p10), %v1326_v22, %v1326_v22 }
 0x10b   : > { %v1360_v39 = vpop.f32.mrb[9].mxu0  ;;  %v1362_v40 = vpop.f32.mrb[9].mxu1  ;;  %v627_v18 = vmul.f32 (!%p1033_p10), %v1356_v37, %v1356_v37 }
 0x10c   : > { %v1364_v41 = vpop.f32.mrb[10].mxu0  ;;  %v1366_v42 = vpop.f32.mrb[10].mxu1  ;;  %v584_v5 = vadd.f32 (!%p1033_p10), %v583_v2, %v1360_v39  ;;  %v625_v12 = vmul.f32 (!%p1033_p10), %v1360_v39, %v1360_v39  ;;  %v655_v16 = vadd.f32 (!%p1033_p10), %v654_v13, %v624_v9  ;;  %v636_v13 = vmul.f32 (!%p1033_p10), %v1334_v26, %v1334_v26 }
 0x10d   : > { %v1368_v43 = vpop.f32.mrb[11].mxu0  ;;  %v1370_v44 = vpop.f32.mrb[11].mxu1  ;;  %v628_v53 = vmul.f32 (!%p1033_p10), %v1364_v41, %v1364_v41 }
 0x10e   : > { %v585_v8 = vadd.f32 (!%p1033_p10), %v584_v5, %v1368_v43  ;;  %v626_v15 = vmul.f32 (!%p1033_p10), %v1368_v43, %v1368_v43  ;;  %v656_v19 = vadd.f32 (!%p1033_p10), %v655_v16, %v625_v12  ;;  %v637_v16 = vmul.f32 (!%p1033_p10), %v1346_v32, %v1346_v32 }
 0x10f   : > { %575 = sbr.rel (%p1033_p10) target bundleno = 333 (0x14d), region = 44 }
 0x110   : > { %v586_v11 = vadd.f32 (!%p1033_p10), %v1356_v37, %v585_v8  ;;  %v657_v54 = vadd.f32 (!%p1033_p10), %v656_v19, %v626_v15  ;;  %v638_v19 = vmul.f32 (!%p1033_p10), %v1354_v36, %v1354_v36 }
 0x112   : > { %v1372_v45 = vpop.f32.mrb[12].mxu0  ;;  %v1374_v46 = vpop.f32.mrb[12].mxu1  ;;  %v587_v14 = vadd.f32 (!%p1033_p10), %v1364_v41, %v586_v11  ;;  %v658_v57 = vadd.f32 (!%p1033_p10), %v657_v54, %v627_v18  ;;  %v639_v54 = vmul.f32 (!%p1033_p10), %v1342_v30, %v1342_v30 }
 0x113   : > { %v1376_v47 = vpop.f32.mrb[13].mxu0  ;;  %v1378_v48 = vpop.f32.mrb[13].mxu1  ;;  %v631_v62 = vmul.f32 (!%p1033_p10), %v1372_v45, %v1372_v45 }
 0x114   : > { %v1380_v49 = vpop.f32.mrb[14].mxu0  ;;  %v1382_v50 = vpop.f32.mrb[14].mxu1  ;;  %v588_v17 = vadd.f32 (!%p1033_p10), %v587_v14, %v1376_v47  ;;  %v629_v56 = vmul.f32 (!%p1033_p10), %v1376_v47, %v1376_v47  ;;  %v659_v60 = vadd.f32 (!%p1033_p10), %v658_v57, %v628_v53  ;;  %v640_v57 = vmul.f32 (!%p1033_p10), %v1350_v34, %v1350_v34 }
 0x115   : > { %v1384_v51 = vpop.f32.mrb[15].mxu0  ;;  %v1386_v52 = vpop.f32.mrb[15].mxu1  ;;  %v632_v1 = vmul.f32 (!%p1033_p10), %v1380_v49, %v1380_v49 }
 0x116   : > { %v589_v20 = vadd.f32 %v588_v17, %v1384_v51  ;;  %v630_v59 = vmul.f32 %v1384_v51, %v1384_v51  ;;  %v660_v63 = vadd.f32 %v659_v60, %v629_v56  ;;  %v641_v60 = vmul.f32 %v1362_v40, %v1362_v40 }
 0x118   : > { %v590_v55 = vadd.f32 %v1372_v45, %v589_v20  ;;  %v661_v2 = vadd.f32 %v660_v63, %v630_v59  ;;  %v642_v63 = vmul.f32 %v1370_v44, %v1370_v44 }
 0x11a   : > { %v591_v58 = vadd.f32 %v1380_v49, %v590_v55  ;;  %v662_v5 = vadd.f32 %v661_v2, %v631_v62  ;;  %v643_v2 = vmul.f32 %v1358_v38, %v1358_v38 }
 0x11c   : > { %v592_v61 = vadd.f32 %v591_v58, %v1330_v24  ;;  %v663_v8 = vadd.f32 %v662_v5, %v632_v1  ;;  %v644_v5 = vmul.f32 %v1366_v42, %v1366_v42 }
 0x11e   : > { %v593_v0 = vadd.f32 %v592_v61, %v1338_v28  ;;  %v664_v11 = vadd.f32 %v663_v8, %v633_v4  ;;  %v645_v8 = vmul.f32 %v1378_v48, %v1378_v48 }
 0x120   : > { %v594_v3 = vadd.f32 %v1326_v22, %v593_v0  ;;  %v665_v14 = vadd.f32 %v664_v11, %v634_v7  ;;  %v646_v11 = vmul.f32 %v1386_v52, %v1386_v52 }
 0x122   : > { %v595_v6 = vadd.f32 %v1334_v26, %v594_v3  ;;  %v666_v17 = vadd.f32 %v665_v14, %v635_v10  ;;  %v647_v14 = vmul.f32 %v1374_v46, %v1374_v46 }
 0x124   : > { %v596_v9 = vadd.f32 %v595_v6, %v1346_v32  ;;  %v667_v20 = vadd.f32 %v666_v17, %v636_v13  ;;  %v648_v17 = vmul.f32 %v1382_v50, %v1382_v50 }
 0x126   : > { %v597_v12 = vadd.f32 %v596_v9, %v1354_v36  ;;  %v668_v55 = vadd.f32 %v667_v20, %v637_v16 }
 0x128   : > { %v598_v15 = vadd.f32 %v1342_v30, %v597_v12  ;;  %v669_v58 = vadd.f32 %v668_v55, %v638_v19 }
 0x12a   : > { %v599_v18 = vadd.f32 %v1350_v34, %v598_v15  ;;  %v670_v61 = vadd.f32 %v669_v58, %v639_v54 }
 0x12c   : > { %v600_v53 = vadd.f32 %v599_v18, %v1362_v40  ;;  %v671_v0 = vadd.f32 %v670_v61, %v640_v57 }
 0x12e   : > { %v601_v56 = vadd.f32 %v600_v53, %v1370_v44  ;;  %v672_v3 = vadd.f32 %v671_v0, %v641_v60  ;;  %v616_v0 = vld [vmem:[#allocation3] sm:$0x1] }
 0x130   : > { %v602_v59 = vadd.f32 %v1358_v38, %v601_v56  ;;  %v673_v6 = vadd.f32 %v672_v3, %v642_v63  ;;  %v576_v56 = vld [vmem:[#allocation2] sm:$0x1] }
 0x132   : > { %v603_v62 = vadd.f32 %v1366_v42, %v602_v59  ;;  %v674_v9 = vadd.f32 %v673_v6, %v643_v2 }
 0x134   : > { %v604_v1 = vadd.f32 %v603_v62, %v1378_v48  ;;  %v675_v12 = vadd.f32 %v674_v9, %v644_v5 }
 0x136   : > { %v605_v4 = vadd.f32 %v604_v1, %v1386_v52  ;;  %v676_v15 = vadd.f32 %v675_v12, %v645_v8 }
 0x138   : > { %v606_v7 = vadd.f32 %v1374_v46, %v605_v4  ;;  %v677_v18 = vadd.f32 %v676_v15, %v646_v11 }
 0x13a   : > { %v607_v10 = vadd.f32 %v1382_v50, %v606_v7  ;;  %v678_v20 = vadd.f32 %v677_v18, %v647_v14 }
 0x13c   : > { %v608_v13 = vrot.slane %v607_v10, 4  ;;  %v679_v54 = vadd.f32 %v678_v20, %v648_v17 }
 0x13e   : > { %v609_v16 = vadd.f32 %v608_v13, %v607_v10  ;;  %v680_v57 = vrot.slane %v679_v54, 4 }
 0x140   : > { %v610_v19 = vrot.slane %v609_v16, 2  ;;  %v681_v59 = vadd.f32 %v680_v57, %v679_v54 }
 0x142   : > { %v611_v53 = vadd.f32 %v610_v19, %v609_v16  ;;  %v682_v61 = vrot.slane %v681_v59, 2 }
 0x144   : > { %v612_v55 = vrot.slane %v611_v53, 1  ;;  %v683_v62 = vadd.f32 %v682_v61, %v681_v59 }
 0x146   : > { %v613_v58 = vadd.f32 %v612_v55, %v611_v53  ;;  %v684_v63 = vrot.slane %v683_v62, 1 }
 0x148   : > { %v614_v60 = vadd.f32 %v613_v58, %v576_v56  ;;  %v685_v1 = vadd.f32 %v684_v63, %v683_v62 }
 0x14a   : > { %615 = vst [vmem:[#allocation2] sm:$0x1] %v614_v60  ;;  %v686_v2 = vadd.f32 %v685_v1, %v616_v0 }
 0x14c   : > { %687 = vst [vmem:[#allocation3] sm:$0x1] %v686_v2 }
 0x14d PF: > { %p688_p11 = scmp.eq.s32.totalorder %s1192_s16, 1 }
 0x14f   : > { %p689_p12 = pnand %p688_p11, %p220_p7 }
 0x150   : > { %v702_v11 = vld [vmem:[%s1644_s2] sm:$0x1] (!%p689_p12) }
 0x151   : > { %692 = sbr.rel (%p689_p12) target bundleno = 366 (0x16e), region = 48  ;;  %v693_v3 = vld [vmem:[#allocation2] sm:$0x1] (!%p689_p12) }
 0x152   : > { %v694_v5 = vmul.f32 (!%p689_p12), 0.001953125, %v693_v3  ;;  %v705_v14 = vld [vmem:[%s1645_s3] sm:$0x1] (!%p689_p12) }
 0x153   : > { %v695_v4 = vld [vmem:[#allocation3] sm:$0x1] (!%p689_p12) }
 0x154   : > { %v696_v6 = vmul.f32 (!%p689_p12), 0.001953125, %v695_v4  ;;  %v697_v7 = vmul.f32 (!%p689_p12), %v694_v5, %v694_v5 }
 0x156   : > { %v698_v8 = vsub.f32 (!%p689_p12), %v696_v6, %v697_v7 }
 0x158   : > { %v699_v9 = vmax.f32 %v698_v8, 0.0 }
 0x15a   : > { %v700_v10 = vadd.f32 1e-05, %v699_v9 }
 0x15c   : > { %1164 = vrsqrt.f32 %v700_v10 }
 0x166   : > { %v1165_v12 = vpop.eup %1164 }
 0x167   : > { %v703_v13 = vmul.f32 %v1165_v12, %v702_v11 }
 0x169   : > { %704 = vst [vmem:[#allocation4] sm:$0x1] %v703_v13  ;;  %v706_v15 = vmul.f32 %v703_v13, %v694_v5 }
 0x16b   : > { %v707_v16 = vsub.f32 %v705_v14, %v706_v15 }
 0x16d   : > { %708 = vst [vmem:[#allocation5] sm:$0x1] %v707_v16 }
 0x16e PF: > { %p1034_p13 = scmp.ne.s32.totalorder %s1192_s16, 1 }
 0x170   : > { %711 = sbr.rel (%p1034_p13) target bundleno = 413 (0x19d), region = 52  ;;  %v1495_v17 = vld [vmem:[#allocation4] ss:$0 sm:$0xff] (!%p1034_p13) }
 0x171   : > { %v719_v19 = vmul.f32 (!%p1034_p13), %v1495_v17, %v1328_v23  ;;  %v720_v20 = vmul.f32 (!%p1034_p13), %v1495_v17, %v1336_v27  ;;  %v721_v53 = vmul.f32 (!%p1034_p13), %v1324_v21, %v1495_v17  ;;  %v722_v54 = vmul.f32 (!%p1034_p13), %v1332_v25, %v1495_v17 }
 0x172   : > { %v723_v55 = vmul.f32 (!%p1034_p13), %v1495_v17, %v1344_v31  ;;  %v724_v56 = vmul.f32 (!%p1034_p13), %v1495_v17, %v1352_v35  ;;  %v725_v57 = vmul.f32 (!%p1034_p13), %v1340_v29, %v1495_v17  ;;  %v726_v23 = vmul.f32 (!%p1034_p13), %v1348_v33, %v1495_v17 }
 0x173   : > { %v727_v9 = vmul.f32 (!%p1034_p13), %v1495_v17, %v1360_v39  ;;  %v728_v10 = vmul.f32 (!%p1034_p13), %v1495_v17, %v1368_v43  ;;  %v729_v12 = vmul.f32 (!%p1034_p13), %v1356_v37, %v1495_v17  ;;  %v730_v13 = vmul.f32 (!%p1034_p13), %v1364_v41, %v1495_v17 }
 0x174   : > { %v1497_v18 = vld [vmem:[#allocation5] ss:$0 sm:$0xff] (!%p1034_p13)  ;;  %v731_v14 = vmul.f32 (!%p1034_p13), %v1495_v17, %v1376_v47  ;;  %v732_v43 = vmul.f32 (!%p1034_p13), %v1495_v17, %v1384_v51  ;;  %v733_v47 = vmul.f32 (!%p1034_p13), %v1372_v45, %v1495_v17 }
 0x175   : > { %v758_v27 = vadd.f32 (!%p1034_p13), %v1497_v18, %v719_v19  ;;  %v759_v58 = vadd.f32 (!%p1034_p13), %v1497_v18, %v720_v20  ;;  %v760_v21 = vadd.f32 (!%p1034_p13), %v1497_v18, %v721_v53  ;;  %v761_v25 = vadd.f32 (!%p1034_p13), %v1497_v18, %v722_v54 }
 0x176   : > { %v762_v59 = vadd.f32 (!%p1034_p13), %v1497_v18, %v723_v55  ;;  %v763_v31 = vadd.f32 (!%p1034_p13), %v1497_v18, %v724_v56  ;;  %v764_v35 = vadd.f32 (!%p1034_p13), %v1497_v18, %v725_v57  ;;  %v765_v29 = vadd.f32 (!%p1034_p13), %v1497_v18, %v726_v23 }
 0x177   : > { %vm790_vm2 = vcmp.ge.f32.partialorder %v758_v27, 0.0  ;;  %v822_v33 = vmul.f32 0.2, %v758_v27  ;;  %vm791_vm3 = vcmp.ge.f32.partialorder %v759_v58, 0.0  ;;  %v823_v60 = vmul.f32 0.2, %v759_v58 }
 0x178   : > { %vm792_vm4 = vcmp.ge.f32.partialorder %v760_v21, 0.0  ;;  %v824_v61 = vmul.f32 0.2, %v760_v21  ;;  %vm793_vm5 = vcmp.ge.f32.partialorder %v761_v25, 0.0  ;;  %v825_v62 = vmul.f32 0.2, %v761_v25 }
 0x179   : > { %v854_v63 = vsel %vm790_vm2, %v758_v27, %v822_v33  ;;  %v855_v0 = vsel %vm791_vm3, %v759_v58, %v823_v60  ;;  %vm794_vm6 = vcmp.ge.f32.partialorder %v762_v59, 0.0  ;;  %v826_v1 = vmul.f32 0.2, %v762_v59 }
 0x17a   : > { %886 = vst [vmem:[%s1281_s6] sm:$0xff] %v854_v63  ;;  %887 = vst [vmem:[%s1281_s6 + $0x8] sm:$0xff] %v855_v0  ;;  %v856_v2 = vsel %vm792_vm4, %v760_v21, %v824_v61  ;;  %v857_v3 = vsel %vm793_vm5, %v761_v25, %v825_v62  ;;  %vm795_vm7 = vcmp.ge.f32.partialorder %v763_v31, 0.0  ;;  %v827_v4 = vmul.f32 0.2, %v763_v31 }
 0x17b   : > { %888 = vst [vmem:[%s1281_s6 + $0x10] sm:$0xff] %v856_v2  ;;  %889 = vst [vmem:[%s1281_s6 + $0x18] sm:$0xff] %v857_v3  ;;  %v858_v5 = vsel %vm794_vm6, %v762_v59, %v826_v1  ;;  %vm796_vm8 = vcmp.ge.f32.partialorder %v764_v35, 0.0  ;;  %v828_v6 = vmul.f32 0.2, %v764_v35  ;;  %vm797_vm9 = vcmp.ge.f32.partialorder %v765_v29, 0.0 }
 0x17c   : > { %890 = vst [vmem:[%s1281_s6 + $0x20] sm:$0xff] %v858_v5  ;;  %v859_v7 = vsel %vm795_vm7, %v763_v31, %v827_v4  ;;  %v829_v8 = vmul.f32 0.2, %v765_v29  ;;  %v766_v16 = vadd.f32 %v1497_v18, %v727_v9  ;;  %v767_v39 = vadd.f32 %v1497_v18, %v728_v10 }
 0x17d   : > { %891 = vst [vmem:[%s1281_s6 + $0x28] sm:$0xff] %v859_v7  ;;  %v860_v11 = vsel %vm796_vm8, %v764_v35, %v828_v6  ;;  %v768_v19 = vadd.f32 %v1497_v18, %v729_v12  ;;  %v769_v37 = vadd.f32 %v1497_v18, %v730_v13  ;;  %v770_v41 = vadd.f32 %v1497_v18, %v731_v14 }
 0x17e   : > { %892 = vst [vmem:[%s1281_s6 + $0x30] sm:$0xff] %v860_v11  ;;  %v861_v15 = vsel %vm797_vm9, %v765_v29, %v829_v8  ;;  %vm798_vm10 = vcmp.ge.f32.partialorder %v766_v16, 0.0  ;;  %v830_v20 = vmul.f32 0.2, %v766_v16  ;;  %vm799_vm11 = vcmp.ge.f32.partialorder %v767_v39, 0.0 }
 0x17f   : > { %893 = vst [vmem:[%s1281_s6 + $0x38] sm:$0xff] %v861_v15  ;;  %v831_v53 = vmul.f32 0.2, %v767_v39  ;;  %vm800_vm12 = vcmp.ge.f32.partialorder %v768_v19, 0.0  ;;  %v832_v51 = vmul.f32 0.2, %v768_v19  ;;  %v771_v45 = vadd.f32 %v1497_v18, %v732_v43 }
 0x180   : > { %vm801_vm13 = vcmp.ge.f32.partialorder %v769_v37, 0.0  ;;  %v833_v54 = vmul.f32 0.2, %v769_v37  ;;  %v862_v55 = vsel %vm798_vm10, %v766_v16, %v830_v20  ;;  %vm802_vm14 = vcmp.ge.f32.partialorder %v770_v41, 0.0 }
 0x181   : > { %v863_v56 = vsel %vm799_vm11, %v767_v39, %v831_v53  ;;  %v834_v57 = vmul.f32 0.2, %v770_v41  ;;  %894 = vst [vmem:[%s1281_s6 + $0x40] sm:$0xff] %v862_v55  ;;  %v864_v23 = vsel %vm800_vm12, %v768_v19, %v832_v51  ;;  %v772_v58 = vadd.f32 %v1497_v18, %v733_v47 }
 0x182   : > { %895 = vst [vmem:[%s1281_s6 + $0x48] sm:$0xff] %v863_v56  ;;  %v865_v27 = vsel %vm801_vm13, %v769_v37, %v833_v54  ;;  %896 = vst [vmem:[%s1281_s6 + $0x50] sm:$0xff] %v864_v23  ;;  %v734_v25 = vmul.f32 %v1380_v49, %v1495_v17  ;;  %v735_v59 = vmul.f32 %v1495_v17, %v1330_v24  ;;  %vm803_vm15 = vcmp.ge.f32.partialorder %v771_v45, 0.0 }
 0x183   : > { %897 = vst [vmem:[%s1281_s6 + $0x58] sm:$0xff] %v865_v27  ;;  %v866_v21 = vsel %vm802_vm14, %v770_v41, %v834_v57  ;;  %v736_v31 = vmul.f32 %v1495_v17, %v1338_v28  ;;  %v835_v35 = vmul.f32 0.2, %v771_v45  ;;  %vm804_vm0 = vcmp.ge.f32.partialorder %v772_v58, 0.0 }
 0x184   : > { %898 = vst [vmem:[%s1281_s6 + $0x60] sm:$0xff] %v866_v21  ;;  %v836_v29 = vmul.f32 0.2, %v772_v58  ;;  %v773_v33 = vadd.f32 %v1497_v18, %v734_v25  ;;  %v774_v60 = vadd.f32 %v1497_v18, %v735_v59  ;;  %v737_v49 = vmul.f32 %v1326_v22, %v1495_v17 }
 0x185   : > { %v775_v61 = vadd.f32 %v1497_v18, %v736_v31  ;;  %v867_v62 = vsel %vm803_vm15, %v771_v45, %v835_v35  ;;  %v738_v63 = vmul.f32 %v1334_v26, %v1495_v17  ;;  %v739_v28 = vmul.f32 %v1495_v17, %v1346_v32 }
 0x186   : > { %v868_v24 = vsel %vm804_vm0, %v772_v58, %v836_v29  ;;  %899 = vst [vmem:[%s1281_s6 + $0x68] sm:$0xff] %v867_v62  ;;  %vm805_vm1 = vcmp.ge.f32.partialorder %v773_v33, 0.0  ;;  %v837_v0 = vmul.f32 0.2, %v773_v33  ;;  %vm806_vm2 = vcmp.ge.f32.partialorder %v774_v60, 0.0 }
 0x187   : > { %900 = vst [vmem:[%s1281_s6 + $0x70] sm:$0xff] %v868_v24  ;;  %v838_v1 = vmul.f32 0.2, %v774_v60  ;;  %vm807_vm3 = vcmp.ge.f32.partialorder %v775_v61, 0.0  ;;  %v839_v2 = vmul.f32 0.2, %v775_v61  ;;  %v776_v22 = vadd.f32 %v1497_v18, %v737_v49 }
 0x188   : > { %v777_v3 = vadd.f32 %v1497_v18, %v738_v63  ;;  %v869_v4 = vsel %vm805_vm1, %v773_v33, %v837_v0  ;;  %v778_v5 = vadd.f32 %v1497_v18, %v739_v28  ;;  %v740_v32 = vmul.f32 %v1495_v17, %v1354_v36 }
 0x189   : > { %v870_v26 = vsel %vm806_vm2, %v774_v60, %v838_v1  ;;  %901 = vst [vmem:[%s1281_s6 + $0x78] sm:$0xff] %v869_v4  ;;  %v871_v6 = vsel %vm807_vm3, %v775_v61, %v839_v2  ;;  %vm808_vm4 = vcmp.ge.f32.partialorder %v776_v22, 0.0  ;;  %v840_v7 = vmul.f32 0.2, %v776_v22 }
 0x18a   : > { %902 = vst [vmem:[%s1281_s6 + $0x80] sm:$0xff] %v870_v26  ;;  %vm809_vm5 = vcmp.ge.f32.partialorder %v777_v3, 0.0  ;;  %903 = vst [vmem:[%s1281_s6 + $0x88] sm:$0xff] %v871_v6  ;;  %v841_v8 = vmul.f32 0.2, %v777_v3  ;;  %vm810_vm6 = vcmp.ge.f32.partialorder %v778_v5, 0.0  ;;  %v779_v10 = vadd.f32 %v1497_v18, %v740_v32 }
 0x18b   : > { %v842_v9 = vmul.f32 0.2, %v778_v5  ;;  %v872_v11 = vsel %vm808_vm4, %v776_v22, %v840_v7  ;;  %v741_v12 = vmul.f32 %v1342_v30, %v1495_v17  ;;  %v742_v36 = vmul.f32 %v1350_v34, %v1495_v17 }
 0x18c   : > { %v743_v13 = vmul.f32 %v1495_v17, %v1362_v40  ;;  %904 = vst [vmem:[%s1281_s6 + $0x90] sm:$0xff] %v872_v11  ;;  %v873_v14 = vsel %vm809_vm5, %v777_v3, %v841_v8  ;;  %vm811_vm7 = vcmp.ge.f32.partialorder %v779_v10, 0.0  ;;  %v843_v16 = vmul.f32 0.2, %v779_v10 }
 0x18d   : > { %v874_v15 = vsel %vm810_vm6, %v778_v5, %v842_v9  ;;  %905 = vst [vmem:[%s1281_s6 + $0x98] sm:$0xff] %v873_v14  ;;  %v780_v39 = vadd.f32 %v1497_v18, %v741_v12  ;;  %v781_v43 = vadd.f32 %v1497_v18, %v742_v36  ;;  %v744_v34 = vmul.f32 %v1495_v17, %v1370_v44 }
 0x18e   : > { %906 = vst [vmem:[%s1281_s6 + $0xa0] sm:$0xff] %v874_v15  ;;  %v782_v30 = vadd.f32 %v1497_v18, %v743_v13  ;;  %v875_v19 = vsel %vm811_vm7, %v779_v10, %v843_v16  ;;  %v745_v40 = vmul.f32 %v1358_v38, %v1495_v17  ;;  %v746_v37 = vmul.f32 %v1366_v42, %v1495_v17 }
 0x18f   : > { %v747_v41 = vmul.f32 %v1495_v17, %v1378_v48  ;;  %907 = vst [vmem:[%s1281_s6 + $0xa8] sm:$0xff] %v875_v19  ;;  %vm812_vm8 = vcmp.ge.f32.partialorder %v780_v39, 0.0  ;;  %v844_v47 = vmul.f32 0.2, %v780_v39  ;;  %vm813_vm9 = vcmp.ge.f32.partialorder %v781_v43, 0.0 }
 0x190   : > { %v845_v20 = vmul.f32 0.2, %v781_v43  ;;  %vm814_vm10 = vcmp.ge.f32.partialorder %v782_v30, 0.0  ;;  %v846_v44 = vmul.f32 0.2, %v782_v30  ;;  %v783_v53 = vadd.f32 %v1497_v18, %v744_v34 }
 0x191   : > { %v784_v38 = vadd.f32 %v1497_v18, %v745_v40  ;;  %v876_v51 = vsel %vm812_vm8, %v780_v39, %v844_v47  ;;  %v785_v42 = vadd.f32 %v1497_v18, %v746_v37  ;;  %v786_v55 = vadd.f32 %v1497_v18, %v747_v41 }
 0x192   : > { %v877_v54 = vsel %vm813_vm9, %v781_v43, %v845_v20  ;;  %908 = vst [vmem:[%s1281_s6 + $0xb0] sm:$0xff] %v876_v51  ;;  %v878_v48 = vsel %vm814_vm10, %v782_v30, %v846_v44  ;;  %vm815_vm11 = vcmp.ge.f32.partialorder %v783_v53, 0.0  ;;  %v847_v56 = vmul.f32 0.2, %v783_v53 }
 0x193   : > { %909 = vst [vmem:[%s1281_s6 + $0xb8] sm:$0xff] %v877_v54  ;;  %vm816_vm12 = vcmp.ge.f32.partialorder %v784_v38, 0.0  ;;  %910 = vst [vmem:[%s1281_s6 + $0xc0] sm:$0xff] %v878_v48  ;;  %v848_v57 = vmul.f32 0.2, %v784_v38  ;;  %vm817_vm13 = vcmp.ge.f32.partialorder %v785_v42, 0.0  ;;  %v748_v58 = vmul.f32 %v1495_v17, %v1386_v52 }
 0x194   : > { %v849_v23 = vmul.f32 0.2, %v785_v42  ;;  %vm818_vm14 = vcmp.ge.f32.partialorder %v786_v55, 0.0  ;;  %v879_v27 = vsel %vm815_vm11, %v783_v53, %v847_v56  ;;  %v850_v45 = vmul.f32 0.2, %v786_v55 }
 0x195   : > { %v749_v21 = vmul.f32 %v1374_v46, %v1495_v17  ;;  %911 = vst [vmem:[%s1281_s6 + $0xc8] sm:$0xff] %v879_v27  ;;  %v880_v25 = vsel %vm816_vm12, %v784_v38, %v848_v57  ;;  %v750_v31 = vmul.f32 %v1382_v50, %v1495_v17  ;;  %v787_v29 = vadd.f32 %v1497_v18, %v748_v58 }
 0x196   : > { %v881_v59 = vsel %vm817_vm13, %v785_v42, %v849_v23  ;;  %912 = vst [vmem:[%s1281_s6 + $0xd0] sm:$0xff] %v880_v25  ;;  %v882_v35 = vsel %vm818_vm14, %v786_v55, %v850_v45 }
 0x197   : > { %913 = vst [vmem:[%s1281_s6 + $0xd8] sm:$0xff] %v881_v59  ;;  %v788_v33 = vadd.f32 %v1497_v18, %v749_v21  ;;  %914 = vst [vmem:[%s1281_s6 + $0xe0] sm:$0xff] %v882_v35  ;;  %v789_v52 = vadd.f32 %v1497_v18, %v750_v31  ;;  %vm819_vm15 = vcmp.ge.f32.partialorder %v787_v29, 0.0  ;;  %v851_v46 = vmul.f32 0.2, %v787_v29 }
 0x199   : > { %vm820_vm0 = vcmp.ge.f32.partialorder %v788_v33, 0.0  ;;  %v852_v60 = vmul.f32 0.2, %v788_v33  ;;  %vm821_vm1 = vcmp.ge.f32.partialorder %v789_v52, 0.0  ;;  %v853_v61 = vmul.f32 0.2, %v789_v52 }
 0x19a   : > { %v883_v50 = vsel %vm819_vm15, %v787_v29, %v851_v46 }
 0x19b   : > { %v884_v17 = vsel %vm820_vm0, %v788_v33, %v852_v60  ;;  %915 = vst [vmem:[%s1281_s6 + $0xe8] sm:$0xff] %v883_v50  ;;  %v885_v49 = vsel %vm821_vm1, %v789_v52, %v853_v61 }
 0x19c   : > { %916 = vst [vmem:[%s1281_s6 + $0xf0] sm:$0xff] %v884_v17  ;;  %917 = vst [vmem:[%s1281_s6 + $0xf8] sm:$0xff] %v885_v49 }
 0x19d PF: > { %s14_s19 = sadd.s32 1, %s1204_s19   ;;  %s1647_s15 = smov %s1196_s17 }
 0x19e   : > { %p11_p0 = scmp.ge.s32.totalorder %s14_s19, 6   ;;  %s1648_s16 = smov %s1200_s18 }
 0x19f   : > { %s1649_s17 = smov %s1652_s20  ;;  %s1650_s18 = smov %s1656_s21 }
 0x1a0   :  { %13 = sbr.rel (!%p11_p0) target bundleno = 3 (0x3), region = 82 }

</bundles_post_ra>
